<compile_context>
chip_gen: v6e
topology: v6e:2x2x1
jax: 0.10.0
libtpu: 0.0.40
codegen_flags: <defaults>
</compile_context>

<pallas_src>
import functools

import jax
import jax.numpy as jnp
from jax.experimental import pallas as pl
from jax.experimental.pallas import tpu as pltpu


# --------------------------------------------------------------------------
# Kernels
# --------------------------------------------------------------------------
def _icon_kron_kernel(mean_ref, inv_std_ref, img_ref, w_ref, out_ref, *,
                      norm_on_input: bool):
    """Fused resize+normalize: one lane-dense 2-D matmul per block.

    img_ref: (Bt, C, P_in)  float      (P_in = H_in*W_in, lane-dense)
    w_ref:   (P_in, P_out)  float32    (kron(Wy, Wx)^T, row-stochastic)
    out_ref: (Bt, C, P_out) float32
    mean_ref / inv_std_ref: (1, C, 1) float32 (broadcast affine)
    """
    Bt, C, P_in = img_ref.shape
    P_out = w_ref.shape[1]

    x = img_ref[...].astype(jnp.float32)
    if norm_on_input:
        # Resize matrices are row-stochastic -> normalization commutes with
        # the resize; apply it on the smaller (input) side.
        x = (x - mean_ref[...]) * inv_std_ref[...]

    y = jnp.dot(x.reshape(Bt * C, P_in), w_ref[...],
                preferred_element_type=jnp.float32)          # (Bt*C, P_out)
    y = y.reshape(Bt, C, P_out)

    if not norm_on_input:
        y = (y - mean_ref[...]) * inv_std_ref[...]

    out_ref[...] = y.astype(out_ref.dtype)                   # single full-block store


def _icon_sep_kernel(mean_ref, inv_std_ref, img_ref, wxt_ref, wyt_ref, out_ref, *,
                     norm_on_input: bool):
    """Separable fallback for large images (kron weight would not fit VMEM).

    img_ref: (Bt, C, H_in, W_in) float
    wxt_ref: (W_in, W_out) f32   (Wx^T)     wyt_ref: (H_in, H_out) f32 (Wy^T)
    out_ref: (Bt, C, H_out*W_out) float32 (lane-dense flattened output)
    """
    Bt, C, H_in, W_in = img_ref.shape
    W_out = wxt_ref.shape[1]
    H_out = wyt_ref.shape[1]

    x = img_ref[...].astype(jnp.float32)
    if norm_on_input:
        x = (x - mean_ref[...].reshape(1, C, 1, 1)) * inv_std_ref[...].reshape(1, C, 1, 1)

    # W-pass: one big 2-D matmul (contracts the last dim).
    t = jnp.dot(x.reshape(Bt * C * H_in, W_in), wxt_ref[...],
                preferred_element_type=jnp.float32)           # (Bt*C*H_in, W_out)
    # H-pass: batched minor transpose + one 2-D matmul (no broadcast of Wy,
    # no per-plane batched matmuls).
    t = jnp.swapaxes(t.reshape(Bt * C, H_in, W_out), -1, -2)  # (Bt*C, W_out, H_in)
    y = jnp.dot(t.reshape(Bt * C * W_out, H_in), wyt_ref[...],
                preferred_element_type=jnp.float32)           # (Bt*C*W_out, H_out)
    y = jnp.swapaxes(y.reshape(Bt * C, W_out, H_out), -1, -2) # (Bt*C, H_out, W_out)
    y = y.reshape(Bt, C, H_out * W_out)

    if not norm_on_input:
        y = (y - mean_ref[...]) * inv_std_ref[...]

    out_ref[...] = y.astype(out_ref.dtype)


# --------------------------------------------------------------------------
# Host-side helpers (plain JAX / Python glue)
# --------------------------------------------------------------------------
def _bilinear_matrix(out_size: int, in_size: int) -> jnp.ndarray:
    """Row-stochastic bilinear interpolation matrix (out_size, in_size),
    matching PyTorch bilinear resize (align_corners=False, no antialias)."""
    scale = in_size / out_size
    src = (jnp.arange(out_size, dtype=jnp.float32) + 0.5) * scale - 0.5
    src = jnp.maximum(src, 0.0)
    x0 = jnp.minimum(jnp.floor(src).astype(jnp.int32), in_size - 1)
    x1 = jnp.minimum(x0 + 1, in_size - 1)
    lam = src - x0.astype(jnp.float32)
    rows = jnp.arange(out_size)
    w = jnp.zeros((out_size, in_size), jnp.float32)
    w = w.at[rows, x0].add(1.0 - lam)
    w = w.at[rows, x1].add(lam)
    return w


def _tpu_config():
    """(tensorcores_per_device, physical VMEM bytes) - generation aware."""
    kind = ""
    try:
        kind = jax.devices()[0].device_kind.lower()
    except Exception:
        pass
    is_v7 = "v7" in kind
    num_tc = 2 if is_v7 else 1            # v5e/v6e: 1 TC per chip; v7x: 2 TCs.
    try:
        vmem_cap = int(pltpu.get_tpu_info().vmem_capacity_bytes)
    except Exception:
        vmem_cap = (64 << 20) if is_v7 else (128 << 20)
    return num_tc, vmem_cap


def _pick_batch_tile(B, io_per_img, interm_per_img, weight_bytes, num_tc, vmem_limit):
    """Largest batch tile that fits the (generation-aware) VMEM budget while
    keeping >= 2 grid steps per TensorCore for pipeline overlap."""
    io_budget = (12 << 20) if num_tc >= 2 else (24 << 20)     # double-buffered I/O blocks
    total_budget = int(vmem_limit * 0.85)                      # incl. kernel intermediates
    cap_io = (io_budget - 2 * weight_bytes) // max(io_per_img, 1)
    cap_total = (total_budget - 2 * weight_bytes) // max(io_per_img + interm_per_img, 1)
    min_steps = 2 * num_tc                                     # >=2 steps per core
    cap_steps = max(1, B // min_steps)
    return int(max(1, min(B, cap_io, cap_total, cap_steps)))


# --------------------------------------------------------------------------
# Public wrapper
# --------------------------------------------------------------------------
def icon_labeler_transform(img: jnp.ndarray,
                           resize_size=(32, 32),
                           mean=(0.485, 0.456, 0.406),
                           std=(0.229, 0.224, 0.225),
                           *,
                           kron_weight_limit_bytes: int = 8 << 20) -> jnp.ndarray:
    """img: (B, C, H_in, W_in) float (f32 or bf16) in [0, 1].
    Returns (B, C, H_out, W_out) float32 — resized + normalized."""
    B, C, H_in, W_in = img.shape
    if isinstance(resize_size, int):
        resize_size = (resize_size, resize_size)
    H_out, W_out = resize_size
    P_in, P_out = H_in * W_in, H_out * W_out
    assert len(mean) == C and len(std) == C

    num_tc, vmem_cap = _tpu_config()
    vmem_limit = int(max(16 << 20, min((32 << 20) if num_tc >= 2 else (64 << 20),
                                       vmem_cap // 2)))

    # f32 interpolation weights (parity with the f32 PyTorch reference; the
    # extra MXU passes vs bf16 are hidden under the HBM-bound roofline).
    wy = _bilinear_matrix(H_out, H_in)                        # (H_out, H_in)
    wx = _bilinear_matrix(W_out, W_in)                        # (W_out, W_in)
    mean_arr = jnp.asarray(mean, jnp.float32).reshape(1, C, 1)
    inv_std_arr = (1.0 / jnp.asarray(std, jnp.float32)).reshape(1, C, 1)

    # Resize matrices are row-stochastic -> normalize on the smaller side.
    norm_on_input = P_in <= P_out
    itemsize = jnp.dtype(img.dtype).itemsize
    kron_bytes = P_in * P_out * 4
    use_kron = kron_bytes <= kron_weight_limit_bytes

    if use_kron:
        io_per_img = 2 * C * (itemsize * P_in + 4 * P_out)    # double-buffered blocks
        interm_per_img = 4 * C * (2 * P_in + 2 * P_out)       # in-kernel f32 temporaries
        weight_bytes = kron_bytes
    else:
        io_per_img = 2 * C * (itemsize * P_in + 4 * P_out)
        interm_per_img = 4 * C * (2 * P_in + 2 * H_in * W_out + 3 * P_out)
        weight_bytes = (W_in * W_out + H_in * H_out) * 4

    bt = _pick_batch_tile(B, io_per_img, interm_per_img, weight_bytes, num_tc, vmem_limit)
    n_blocks = pl.cdiv(B, bt)
    B_pad = n_blocks * bt
    if B_pad != B:                                            # ragged batch: pad, slice later
        img = jnp.pad(img, ((0, B_pad - B), (0, 0), (0, 0), (0, 0)))

    cparams = pltpu.CompilerParams(dimension_semantics=("parallel",),
                                   vmem_limit_bytes=vmem_limit)
    const3 = lambda i: (0, 0, 0)

    if use_kron:
        # kron(Wy, Wx)^T, shape (P_in, P_out): out_flat = in_flat @ w.
        w_kron = jnp.einsum("ih,jw->hwij", wy, wx).reshape(P_in, P_out)
        img_flat = img.reshape(B_pad, C, P_in)                # lane-dense input
        out_flat = pl.pallas_call(
            functools.partial(_icon_kron_kernel, norm_on_input=norm_on_input),
            out_shape=jax.ShapeDtypeStruct((B_pad, C, P_out), jnp.float32),
            grid=(n_blocks,),
            in_specs=[
                pl.BlockSpec((1, C, 1), const3),              # mean (constant block)
                pl.BlockSpec((1, C, 1), const3),              # 1/std
                pl.BlockSpec((bt, C, P_in), lambda i: (i, 0, 0)),
                pl.BlockSpec((P_in, P_out), lambda i: (0, 0)),
            ],
            out_specs=pl.BlockSpec((bt, C, P_out), lambda i: (i, 0, 0)),
            compiler_params=cparams,
        )(mean_arr, inv_std_arr, img_flat, w_kron)
    else:
        out_flat = pl.pallas_call(
            functools.partial(_icon_sep_kernel, norm_on_input=norm_on_input),
            out_shape=jax.ShapeDtypeStruct((B_pad, C, P_out), jnp.float32),
            grid=(n_blocks,),
            in_specs=[
                pl.BlockSpec((1, C, 1), const3),
                pl.BlockSpec((1, C, 1), const3),
                pl.BlockSpec((bt, C, H_in, W_in), lambda i: (i, 0, 0, 0)),
                pl.BlockSpec((W_in, W_out), lambda i: (0, 0)),   # Wx^T
                pl.BlockSpec((H_in, H_out), lambda i: (0, 0)),   # Wy^T
            ],
            out_specs=pl.BlockSpec((bt, C, P_out), lambda i: (i, 0, 0)),
            compiler_params=cparams,
        )(mean_arr, inv_std_arr, img, wx.T, wy.T)

    out = out_flat.reshape(B_pad, C, H_out, W_out)
    return out[:B] if B_pad != B else out


if __name__ == "__main__":
    key = jax.random.PRNGKey(0)
    # Small shapes consistent with the module: batch=2, 3 RGB channels,
    # 16x16 input resized to 32x32 (stand-in for the 224 default).
    img = jax.random.uniform(key, (2, 3, 16, 16), dtype=jnp.float32)
    out = icon_labeler_transform(img, resize_size=(32, 32))
    jax.block_until_ready(out)
    assert out.shape == (2, 3, 32, 32) and out.dtype == jnp.float32
    assert bool(jnp.all(jnp.isfinite(out)))

    # Ragged (non-divisor) batch: exercises the cdiv grid + padding path.
    img2 = jax.random.uniform(jax.random.PRNGKey(0), (5, 3, 16, 16), dtype=jnp.float32)
    out2 = icon_labeler_transform(img2, resize_size=(32, 32))
    jax.block_until_ready(out2)
    assert out2.shape == (5, 3, 32, 32) and out2.dtype == jnp.float32

    print("KERNEL_OK")
</pallas_src>

<mosaic_0001>
module attributes {stable_mosaic.version = 11 : i64} {
  func.func @_icon_kron_kernel(%arg0: i32, %arg1: memref<1x3x1xf32, #tpu.memory_space<vmem>>, %arg2: memref<1x3x1xf32, #tpu.memory_space<vmem>>, %arg3: memref<1x3x256xf32, #tpu.memory_space<vmem>>, %arg4: memref<256x1024xf32, #tpu.memory_space<vmem>>, %arg5: memref<1x3x1024xf32, #tpu.memory_space<vmem>>) attributes {dimension_semantics = [#tpu.dimension_semantics<parallel>], iteration_bounds = array<i64: 2>, scalar_prefetch = 0 : i64, scratch_operands = 0 : i64, tpu.core_type = #tpu.core_type<tc>, window_params = [{pipeline_mode = #tpu.pipeline_mode<synchronous>, transform_indices = @transform_0, window_bounds = array<i64: 1, 3, 1>}, {pipeline_mode = #tpu.pipeline_mode<synchronous>, transform_indices = @transform_1, window_bounds = array<i64: 1, 3, 1>}, {transform_indices = @transform_2, window_bounds = array<i64: 1, 3, 256>}, {pipeline_mode = #tpu.pipeline_mode<synchronous>, transform_indices = @transform_3, window_bounds = array<i64: 256, 1024>}, {transform_indices = @transform_4, window_bounds = array<i64: 1, 3, 1024>}]} {
    %c0 = arith.constant 0 : index
    %c0_0 = arith.constant 0 : index
    %c0_1 = arith.constant 0 : index
    %0 = vector.load %arg3[%c0, %c0_0, %c0_1] : memref<1x3x256xf32, #tpu.memory_space<vmem>>, vector<1x3x256xf32>
    %c0_2 = arith.constant 0 : index
    %c0_3 = arith.constant 0 : index
    %c0_4 = arith.constant 0 : index
    %1 = vector.load %arg1[%c0_2, %c0_3, %c0_4] : memref<1x3x1xf32, #tpu.memory_space<vmem>>, vector<1x3x1xf32>
    %2 = vector.broadcast %1 : vector<1x3x1xf32> to vector<1x3x256xf32>
    %3 = arith.subf %0, %2 : vector<1x3x256xf32>
    %c0_5 = arith.constant 0 : index
    %c0_6 = arith.constant 0 : index
    %c0_7 = arith.constant 0 : index
    %4 = vector.load %arg2[%c0_5, %c0_6, %c0_7] : memref<1x3x1xf32, #tpu.memory_space<vmem>>, vector<1x3x1xf32>
    %5 = vector.broadcast %4 : vector<1x3x1xf32> to vector<1x3x256xf32>
    %6 = arith.mulf %3, %5 : vector<1x3x256xf32>
    %7 = vector.shape_cast %6 : vector<1x3x256xf32> to vector<3x256xf32>
    %c0_8 = arith.constant 0 : index
    %c0_9 = arith.constant 0 : index
    %8 = vector.load %arg4[%c0_8, %c0_9] : memref<256x1024xf32, #tpu.memory_space<vmem>>, vector<256x1024xf32>
    %cst = arith.constant dense<0.000000e+00> : vector<3x1024xf32>
    %9 = tpu.matmul %7, %8, %cst {dimension_numbers = #tpu.dot_dimension_numbers<[1], [0], [0], [1], [0, 0, 1, 1], [], []>} : vector<3x256xf32>, vector<256x1024xf32>, vector<3x1024xf32> -> vector<3x1024xf32>
    %10 = vector.shape_cast %9 : vector<3x1024xf32> to vector<1x3x1024xf32>
    %c0_10 = arith.constant 0 : index
    %c0_11 = arith.constant 0 : index
    %c0_12 = arith.constant 0 : index
    %11 = vector.load %arg5[%c0_10, %c0_11, %c0_12] : memref<1x3x1024xf32, #tpu.memory_space<vmem>>, vector<1x3x1024xf32>
    tpu.vector_store %arg5[%c0_10, %c0_11, %c0_12], %10 {strides = array<i32>} : memref<1x3x1024xf32, #tpu.memory_space<vmem>>, vector<1x3x1024xf32>,
    return
  }
  func.func @transform_0(%arg0: i32) -> (i32, i32, i32) {
    %c0_i32 = arith.constant 0 : i32
    %c0_i32_0 = arith.constant 0 : i32
    %c0_i32_1 = arith.constant 0 : i32
    %c0_i32_2 = arith.constant 0 : i32
    return %c0_i32, %c0_i32_0, %c0_i32_1 : i32, i32, i32
  }
  func.func @transform_1(%arg0: i32) -> (i32, i32, i32) {
    %c0_i32 = arith.constant 0 : i32
    %c0_i32_0 = arith.constant 0 : i32
    %c0_i32_1 = arith.constant 0 : i32
    %c0_i32_2 = arith.constant 0 : i32
    return %c0_i32, %c0_i32_0, %c0_i32_1 : i32, i32, i32
  }
  func.func @transform_2(%arg0: i32) -> (i32, i32, i32) {
    %c0_i32 = arith.constant 0 : i32
    %c0_i32_0 = arith.constant 0 : i32
    %c0_i32_1 = arith.constant 0 : i32
    return %arg0, %c0_i32, %c0_i32_0 : i32, i32, i32
  }
  func.func @transform_3(%arg0: i32) -> (i32, i32) {
    %c0_i32 = arith.constant 0 : i32
    %c0_i32_0 = arith.constant 0 : i32
    %c0_i32_1 = arith.constant 0 : i32
    return %c0_i32, %c0_i32_0 : i32, i32
  }
  func.func @transform_4(%arg0: i32) -> (i32, i32, i32) {
    %c0_i32 = arith.constant 0 : i32
    %c0_i32_0 = arith.constant 0 : i32
    %c0_i32_1 = arith.constant 0 : i32
    return %arg0, %c0_i32, %c0_i32_0 : i32, i32, i32
  }
}

</mosaic_0001>

<bundles_post_ra>
// kernel: tpu_custom_call.1
= control target key start
LH: loop header
LB: loop body
LE: loop exit
PB: predicated region body
PF: predicated region fallthrough
CT: control target
= control target key end

     0   :  { %9 = vsyncpa [#allocation3], 0  ;;  %s979_s15 = smov 0   ;;  %s1036_s0 = inlined_call_operand.vmem [shape: f32[1,3,1], index: 0, kind: input, shape index: {}]   ;;  %s1037_s1 = inlined_call_operand.vmem [shape: f32[1,3,1], index: 1, kind: input, shape index: {}]   ;;  %s1038_s2 = inlined_call_operand.vmem [shape: f32[2,3,256], index: 2, kind: input, shape index: {}]   ;;  %s1039_s3 = inlined_call_operand.hbm [shape: f32[256,1024], index: 3, kind: input, shape index: {}]   ;;  %s1040_s4 = inlined_call_operand.vmem [shape: f32[2,3,1024], index: 4, kind: output, shape index: {}]  }
   0x1 LB: > { %s985_s16 = sadd.s32 4294967295, %s947_s15   ;;  %p874_p0 = scmp.ge.s32.totalorder %s947_s15, 1  ;;  %s947_s15 = sphi %s979_s15, %s15_s15  }
   0x2   : > { %p135_p1 = scmp.lt.s32.totalorder %s947_s15, 3  ;;  %s949_s17 = smov [#allocation2]  }
   0x3   : > { %s153_s18 = sshll.u32 %s949_s17, 4  ;;  %p895_p3 = scmp.eq.s32.totalorder %s985_s16, 0  ;;  %s154_s18 = int_to_ptr.vmem [resolvable:$true] %s153_s18 }
   0x4   : > { %p989_p2 = pnand %p874_p0, %p135_p1  ;;  %s922_s20 = scalar_lea.vmem %s154_s18, 32768 }
   0x5   : > { %p923_p7 = scmp.ne.s32.totalorder %s154_s18, %s922_s20  ;;  %p930_p10 = scmp.lt.s32.totalorder %s154_s18, %s154_s18 }
   0x6   : > { %p891_p4 = pneg %p989_p2  ;;  %p931_p11 = scmp.lt.s32.totalorder %s922_s20, %s922_s20 }
   0x8   : > { %p892_p5 = pnand %p895_p3, %p891_p4  ;;  %p932_p12 = por %p931_p11, %p930_p10 }
   0xa   : > { %p913_p6 = pneg %p892_p5 }
   0xc   : > { %p925_p8 = pnand %p923_p7, %p913_p6 }
   0xe   : > { %p926_p9 = pneg %p925_p8 }
  0x10   : > { %p933_p13 = pnand %p932_p12, %p926_p9 }
  0x12   : > { %936 = shalt.err (!%p933_p13)
}
  0x13   : > { %s950_s21 = smov 1024   ;;  %s951_s22 = smov 64  }
  0x14   : > { %894 = dma.hbm_to_vmem [thread:$0]  (!%p892_p5), %s1039_s3, 32768, %s154_s18, [#allocation3], %s950_s21, %s950_s21, %s951_s22  }
  0x15   : > { %177 = sbr.rel (%p989_p2) target bundleno = 427 (0x1ab), region = 36 }
  0x1a   : > { %942 = dma.done.wait (%p895_p3), [#allocation3], 32768  }
  0x1b   : > { %944 = vsyncadd (%p895_p3), [#allocation3], 4294934528  ;;  %v952_v0 = vmov 0   ;;  %v214_v1 = vld [vmem:[%s1036_s0] sm:$0x7]  ;;  %v363_v3 = vld [vmem:[#allocation2 + $0x3c8] sm:$0xff] }
  0x1c   : > { %910 = vset.pattern.permute.xlu0 %v952_v0  ;;  %v228_v2 = vld [vmem:[%s1037_s1] sm:$0x7]  ;;  %501 = vmatprep.subr.mxu0 %v363_v3  ;;  %v365_v4 = vld [vmem:[#allocation2 + $0x3d8] sm:$0xff]  ;;  %v364_v6 = vld [vmem:[#allocation2 + $0x3d0] sm:$0xff]  ;;  %p203_p0 = scmp.lt.s32.totalorder %s985_s16, 1 }
  0x1d   : > { %217 = vperm.xlu0 %910, %v214_v1   ;;  %v362_v5 = vld [vmem:[#allocation2 + $0x3c0] sm:$0xff]  ;;  %572 = vmatprep.subr.mxu1 %v365_v4  ;;  %v355_v7 = vld [vmem:[#allocation2 + $0x388] sm:$0xff]  ;;  %v357_v8 = vld [vmem:[#allocation2 + $0x398] sm:$0xff] }
  0x1e   : > { %502 = vmatpush1.msra.mxu0 %v362_v5  ;;  %v354_v9 = vld [vmem:[#allocation2 + $0x380] sm:$0xff]  ;;  %573 = vmatpush1.msra.mxu1 %v364_v6  ;;  %v356_v10 = vld [vmem:[#allocation2 + $0x390] sm:$0xff]  ;;  %v347_v11 = vld [vmem:[#allocation2 + $0x348] sm:$0xff]  ;;  %s1043_s16 = smov (!%p203_p0, %s985_s16), 1 }
  0x1f   : > { %503 = vmatprep.subr.mxu0 %v355_v7  ;;  %v349_v12 = vld [vmem:[#allocation2 + $0x358] sm:$0xff]  ;;  %574 = vmatprep.subr.mxu1 %v357_v8  ;;  %v346_v13 = vld [vmem:[#allocation2 + $0x340] sm:$0xff]  ;;  %v348_v14 = vld [vmem:[#allocation2 + $0x350] sm:$0xff]  ;;  %s885_s29 = sshll.u32 %s1043_s16, 3  ;;  %s886_s7 = sshll.u32 %s1043_s16, 5 }
  0x20   : > { %504 = vmatpush1.msra.mxu0 %v354_v9  ;;  %575 = vmatpush1.msra.mxu1 %v356_v10  ;;  %v339_v15 = vld [vmem:[#allocation2 + $0x308] sm:$0xff]  ;;  %v341_v16 = vld [vmem:[#allocation2 + $0x318] sm:$0xff]  ;;  %v338_v17 = vld [vmem:[#allocation2 + $0x300] sm:$0xff]  ;;  %s207_s6 = scalar_lea.vmem %s1038_s2, %s885_s29  ;;  %s212_s10 = scalar_lea.vmem %s1040_s4, %s886_s7 }
  0x21   : > { %231 = vperm.xlu0 %910, %v228_v2   ;;  %505 = vmatprep.subr.mxu0 %v347_v11  ;;  %v340_v18 = vld [vmem:[#allocation2 + $0x310] sm:$0xff]  ;;  %v331_v19 = vld [vmem:[#allocation2 + $0x2c8] sm:$0xff]  ;;  %v333_v20 = vld [vmem:[#allocation2 + $0x2d8] sm:$0xff] }
  0x22   : > { %576 = vmatprep.subr.mxu1 %v349_v12  ;;  %506 = vmatpush1.msra.mxu0 %v346_v13  ;;  %v330_v21 = vld [vmem:[#allocation2 + $0x2c0] sm:$0xff]  ;;  %v332_v22 = vld [vmem:[#allocation2 + $0x2d0] sm:$0xff]  ;;  %v323_v23 = vld [vmem:[#allocation2 + $0x288] sm:$0xff] }
  0x23   : > { %577 = vmatpush1.msra.mxu1 %v348_v14  ;;  %507 = vmatprep.subr.mxu0 %v339_v15  ;;  %v325_v24 = vld [vmem:[#allocation2 + $0x298] sm:$0xff]  ;;  %v322_v25 = vld [vmem:[#allocation2 + $0x280] sm:$0xff]  ;;  %v324_v26 = vld [vmem:[#allocation2 + $0x290] sm:$0xff] }
  0x24   : > { %578 = vmatprep.subr.mxu1 %v341_v16  ;;  %508 = vmatpush1.msra.mxu0 %v338_v17  ;;  %v315_v27 = vld [vmem:[#allocation2 + $0x248] sm:$0xff]  ;;  %v317_v28 = vld [vmem:[#allocation2 + $0x258] sm:$0xff]  ;;  %v314_v29 = vld [vmem:[#allocation2 + $0x240] sm:$0xff] }
  0x25   : > { %579 = vmatpush1.msra.mxu1 %v340_v18  ;;  %509 = vmatprep.subr.mxu0 %v331_v19  ;;  %v316_v30 = vld [vmem:[#allocation2 + $0x250] sm:$0xff]  ;;  %v307_v31 = vld [vmem:[#allocation2 + $0x208] sm:$0xff]  ;;  %v309_v32 = vld [vmem:[#allocation2 + $0x218] sm:$0xff] }
  0x26   : > { %580 = vmatprep.subr.mxu1 %v333_v20  ;;  %510 = vmatpush1.msra.mxu0 %v330_v21  ;;  %v306_v33 = vld [vmem:[#allocation2 + $0x200] sm:$0xff]  ;;  %v308_v34 = vld [vmem:[#allocation2 + $0x210] sm:$0xff]  ;;  %v299_v35 = vld [vmem:[#allocation2 + $0x1c8] sm:$0xff] }
  0x27   : > { %581 = vmatpush1.msra.mxu1 %v332_v22  ;;  %511 = vmatprep.subr.mxu0 %v323_v23  ;;  %v301_v36 = vld [vmem:[#allocation2 + $0x1d8] sm:$0xff]  ;;  %v298_v37 = vld [vmem:[#allocation2 + $0x1c0] sm:$0xff]  ;;  %v300_v38 = vld [vmem:[#allocation2 + $0x1d0] sm:$0xff] }
  0x28   : > { %582 = vmatprep.subr.mxu1 %v325_v24  ;;  %512 = vmatpush1.msra.mxu0 %v322_v25  ;;  %v291_v39 = vld [vmem:[#allocation2 + $0x188] sm:$0xff]  ;;  %v293_v40 = vld [vmem:[#allocation2 + $0x198] sm:$0xff]  ;;  %v290_v41 = vld [vmem:[#allocation2 + $0x180] sm:$0xff] }
  0x29   : > { %583 = vmatpush1.msra.mxu1 %v324_v26  ;;  %513 = vmatprep.subr.mxu0 %v315_v27  ;;  %v292_v42 = vld [vmem:[#allocation2 + $0x190] sm:$0xff]  ;;  %v283_v43 = vld [vmem:[#allocation2 + $0x148] sm:$0xff]  ;;  %v285_v44 = vld [vmem:[#allocation2 + $0x158] sm:$0xff] }
  0x2a   : > { %584 = vmatprep.subr.mxu1 %v317_v28  ;;  %514 = vmatpush1.msra.mxu0 %v314_v29  ;;  %v282_v45 = vld [vmem:[#allocation2 + $0x140] sm:$0xff]  ;;  %v284_v46 = vld [vmem:[#allocation2 + $0x150] sm:$0xff]  ;;  %v275_v47 = vld [vmem:[#allocation2 + $0x108] sm:$0xff] }
  0x2b   : > { %585 = vmatpush1.msra.mxu1 %v316_v30  ;;  %515 = vmatprep.subr.mxu0 %v307_v31  ;;  %v277_v48 = vld [vmem:[#allocation2 + $0x118] sm:$0xff]  ;;  %v274_v49 = vld [vmem:[#allocation2 + $0x100] sm:$0xff]  ;;  %v276_v50 = vld [vmem:[#allocation2 + $0x110] sm:$0xff] }
  0x2c   : > { %586 = vmatprep.subr.mxu1 %v309_v32  ;;  %516 = vmatpush1.msra.mxu0 %v306_v33  ;;  %v267_v51 = vld [vmem:[#allocation2 + $0xc8] sm:$0xff]  ;;  %v269_v52 = vld [vmem:[#allocation2 + $0xd8] sm:$0xff]  ;;  %v266_v53 = vld [vmem:[#allocation2 + $0xc0] sm:$0xff] }
  0x2d   : > { %587 = vmatpush1.msra.mxu1 %v308_v34  ;;  %517 = vmatprep.subr.mxu0 %v299_v35  ;;  %v268_v54 = vld [vmem:[#allocation2 + $0xd0] sm:$0xff]  ;;  %v259_v55 = vld [vmem:[#allocation2 + $0x88] sm:$0xff]  ;;  %v261_v56 = vld [vmem:[#allocation2 + $0x98] sm:$0xff] }
  0x2e   : > { %588 = vmatprep.subr.mxu1 %v301_v36  ;;  %518 = vmatpush1.msra.mxu0 %v298_v37  ;;  %v258_v57 = vld [vmem:[#allocation2 + $0x80] sm:$0xff]  ;;  %v260_v58 = vld [vmem:[#allocation2 + $0x90] sm:$0xff]  ;;  %v251_v59 = vld [vmem:[#allocation2 + $0x48] sm:$0xff] }
  0x2f   : > { %589 = vmatpush1.msra.mxu1 %v300_v38  ;;  %519 = vmatprep.subr.mxu0 %v291_v39  ;;  %v253_v60 = vld [vmem:[#allocation2 + $0x58] sm:$0xff]  ;;  %v250_v61 = vld [vmem:[#allocation2 + $0x40] sm:$0xff]  ;;  %v252_v62 = vld [vmem:[#allocation2 + $0x50] sm:$0xff] }
  0x30   : > { %590 = vmatprep.subr.mxu1 %v293_v40  ;;  %520 = vmatpush1.msra.mxu0 %v290_v41  ;;  %v243_v63 = vld [vmem:[#allocation2 + $0x8] sm:$0xff]  ;;  %v245_v0 = vld [vmem:[#allocation2 + $0x18] sm:$0xff]  ;;  %v242_v1 = vld [vmem:[#allocation2] sm:$0xff] }
  0x31   : > { %591 = vmatpush1.msra.mxu1 %v292_v42  ;;  %521 = vmatprep.subr.mxu0 %v283_v43  ;;  %v244_v2 = vld [vmem:[#allocation2 + $0x10] sm:$0xff]  ;;  %v491_v3 = vld [vmem:[#allocation2 + $0x7c8] sm:$0xff]  ;;  %v493_v4 = vld [vmem:[#allocation2 + $0x7d8] sm:$0xff] }
  0x32   : > { %592 = vmatprep.subr.mxu1 %v285_v44  ;;  %522 = vmatpush1.msra.mxu0 %v282_v45  ;;  %v490_v5 = vld [vmem:[#allocation2 + $0x7c0] sm:$0xff]  ;;  %v492_v6 = vld [vmem:[#allocation2 + $0x7d0] sm:$0xff]  ;;  %v483_v7 = vld [vmem:[#allocation2 + $0x788] sm:$0xff] }
  0x33   : > { %593 = vmatpush1.msra.mxu1 %v284_v46  ;;  %523 = vmatprep.subr.mxu0 %v275_v47  ;;  %v485_v8 = vld [vmem:[#allocation2 + $0x798] sm:$0xff]  ;;  %v482_v9 = vld [vmem:[#allocation2 + $0x780] sm:$0xff]  ;;  %v484_v10 = vld [vmem:[#allocation2 + $0x790] sm:$0xff] }
  0x34   : > { %594 = vmatprep.subr.mxu1 %v277_v48  ;;  %524 = vmatpush1.msra.mxu0 %v274_v49  ;;  %v475_v11 = vld [vmem:[#allocation2 + $0x748] sm:$0xff]  ;;  %v477_v12 = vld [vmem:[#allocation2 + $0x758] sm:$0xff]  ;;  %v474_v13 = vld [vmem:[#allocation2 + $0x740] sm:$0xff] }
  0x35   : > { %595 = vmatpush1.msra.mxu1 %v276_v50  ;;  %525 = vmatprep.subr.mxu0 %v267_v51  ;;  %v476_v14 = vld [vmem:[#allocation2 + $0x750] sm:$0xff]  ;;  %v467_v15 = vld [vmem:[#allocation2 + $0x708] sm:$0xff]  ;;  %v469_v16 = vld [vmem:[#allocation2 + $0x718] sm:$0xff] }
  0x36   : > { %596 = vmatprep.subr.mxu1 %v269_v52  ;;  %526 = vmatpush1.msra.mxu0 %v266_v53  ;;  %v466_v17 = vld [vmem:[#allocation2 + $0x700] sm:$0xff]  ;;  %v468_v18 = vld [vmem:[#allocation2 + $0x710] sm:$0xff]  ;;  %v459_v19 = vld [vmem:[#allocation2 + $0x6c8] sm:$0xff] }
  0x37   : > { %597 = vmatpush1.msra.mxu1 %v268_v54  ;;  %527 = vmatprep.subr.mxu0 %v259_v55  ;;  %v461_v20 = vld [vmem:[#allocation2 + $0x6d8] sm:$0xff]  ;;  %v458_v21 = vld [vmem:[#allocation2 + $0x6c0] sm:$0xff]  ;;  %v460_v22 = vld [vmem:[#allocation2 + $0x6d0] sm:$0xff] }
  0x38   : > { %598 = vmatprep.subr.mxu1 %v261_v56  ;;  %528 = vmatpush1.msra.mxu0 %v258_v57  ;;  %v451_v23 = vld [vmem:[#allocation2 + $0x688] sm:$0xff]  ;;  %v453_v24 = vld [vmem:[#allocation2 + $0x698] sm:$0xff]  ;;  %v450_v25 = vld [vmem:[#allocation2 + $0x680] sm:$0xff] }
  0x39   : > { %599 = vmatpush1.msra.mxu1 %v260_v58  ;;  %529 = vmatprep.subr.mxu0 %v251_v59  ;;  %v452_v26 = vld [vmem:[#allocation2 + $0x690] sm:$0xff]  ;;  %v443_v27 = vld [vmem:[#allocation2 + $0x648] sm:$0xff]  ;;  %v445_v28 = vld [vmem:[#allocation2 + $0x658] sm:$0xff] }
  0x3a   : > { %600 = vmatprep.subr.mxu1 %v253_v60  ;;  %530 = vmatpush1.msra.mxu0 %v250_v61  ;;  %v442_v29 = vld [vmem:[#allocation2 + $0x640] sm:$0xff]  ;;  %v444_v30 = vld [vmem:[#allocation2 + $0x650] sm:$0xff]  ;;  %v435_v31 = vld [vmem:[#allocation2 + $0x608] sm:$0xff] }
  0x3b   : > { %601 = vmatpush1.msra.mxu1 %v252_v62  ;;  %531 = vmatprep.subr.mxu0 %v243_v63  ;;  %v437_v32 = vld [vmem:[#allocation2 + $0x618] sm:$0xff]  ;;  %v434_v33 = vld [vmem:[#allocation2 + $0x600] sm:$0xff]  ;;  %v436_v34 = vld [vmem:[#allocation2 + $0x610] sm:$0xff] }
  0x3c   : > { %602 = vmatprep.subr.mxu1 %v245_v0  ;;  %532 = vmatpush1.msra.mxu0 %v242_v1  ;;  %v427_v35 = vld [vmem:[#allocation2 + $0x5c8] sm:$0xff]  ;;  %v429_v36 = vld [vmem:[#allocation2 + $0x5d8] sm:$0xff]  ;;  %v426_v37 = vld [vmem:[#allocation2 + $0x5c0] sm:$0xff] }
  0x3d   : > { %603 = vmatpush1.msra.mxu1 %v244_v2  ;;  %533 = vmatprep.subr.mxu0 %v491_v3  ;;  %v428_v38 = vld [vmem:[#allocation2 + $0x5d0] sm:$0xff]  ;;  %v419_v39 = vld [vmem:[#allocation2 + $0x588] sm:$0xff]  ;;  %v421_v40 = vld [vmem:[#allocation2 + $0x598] sm:$0xff] }
  0x3e   : > { %604 = vmatprep.subr.mxu1 %v493_v4  ;;  %534 = vmatpush2.msra.mxu0 %v490_v5  ;;  %v418_v41 = vld [vmem:[#allocation2 + $0x580] sm:$0xff]  ;;  %v420_v42 = vld [vmem:[#allocation2 + $0x590] sm:$0xff]  ;;  %v411_v43 = vld [vmem:[#allocation2 + $0x548] sm:$0xff]  ;;  %v953_v5 = vmov 839922192  }
  0x3f   : > { %605 = vmatpush2.msra.mxu1 %v492_v6  ;;  %535 = vmatprep.subr.mxu0 %v483_v7  ;;  %v413_v44 = vld [vmem:[#allocation2 + $0x558] sm:$0xff]  ;;  %v410_v45 = vld [vmem:[#allocation2 + $0x540] sm:$0xff]  ;;  %v412_v46 = vld [vmem:[#allocation2 + $0x550] sm:$0xff]  ;;  %v220_v6 = vunpack.c.l.s4 %v953_v5  ;;  %v222_v7 = vlaneseq }
  0x40   : > { %606 = vmatprep.subr.mxu1 %v485_v8  ;;  %536 = vmatpush2.msra.mxu0 %v482_v9  ;;  %v403_v47 = vld [vmem:[#allocation2 + $0x508] sm:$0xff]  ;;  %v405_v48 = vld [vmem:[#allocation2 + $0x518] sm:$0xff]  ;;  %v402_v49 = vld [vmem:[#allocation2 + $0x500] sm:$0xff] }
  0x41   : > { %607 = vmatpush2.msra.mxu1 %v484_v10  ;;  %537 = vmatprep.subr.mxu0 %v475_v11  ;;  %v404_v50 = vld [vmem:[#allocation2 + $0x510] sm:$0xff]  ;;  %v395_v51 = vld [vmem:[#allocation2 + $0x4c8] sm:$0xff]  ;;  %v397_v52 = vld [vmem:[#allocation2 + $0x4d8] sm:$0xff]  ;;  %v221_v8 = vunpack.c.0.s8 %v220_v6  ;;  %v223_v9 = vshrl.u32 %v222_v7, 7 }
  0x42   : > { %608 = vmatprep.subr.mxu1 %v477_v12  ;;  %538 = vmatpush2.msra.mxu0 %v474_v13  ;;  %v394_v53 = vld [vmem:[#allocation2 + $0x4c0] sm:$0xff]  ;;  %v396_v54 = vld [vmem:[#allocation2 + $0x4d0] sm:$0xff]  ;;  %v387_v55 = vld [vmem:[#allocation2 + $0x488] sm:$0xff] }
  0x43   : > { %609 = vmatpush2.msra.mxu1 %v476_v14  ;;  %539 = vmatprep.subr.mxu0 %v467_v15  ;;  %v389_v56 = vld [vmem:[#allocation2 + $0x498] sm:$0xff]  ;;  %v386_v57 = vld [vmem:[#allocation2 + $0x480] sm:$0xff]  ;;  %v388_v58 = vld [vmem:[#allocation2 + $0x490] sm:$0xff]  ;;  %v224_v10 = vsub.s32 %v221_v8, %v223_v9 }
  0x44   : > { %610 = vmatprep.subr.mxu1 %v469_v16  ;;  %540 = vmatpush2.msra.mxu0 %v466_v17  ;;  %v379_v59 = vld [vmem:[#allocation2 + $0x448] sm:$0xff]  ;;  %v381_v60 = vld [vmem:[#allocation2 + $0x458] sm:$0xff]  ;;  %v378_v61 = vld [vmem:[#allocation2 + $0x440] sm:$0xff] }
  0x45   : > { %611 = vmatpush2.msra.mxu1 %v468_v18  ;;  %541 = vmatprep.subr.mxu0 %v459_v19  ;;  %v380_v62 = vld [vmem:[#allocation2 + $0x450] sm:$0xff]  ;;  %v371_v63 = vld [vmem:[#allocation2 + $0x408] sm:$0xff]  ;;  %v373_v0 = vld [vmem:[#allocation2 + $0x418] sm:$0xff] }
  0x46   : > { %612 = vmatprep.subr.mxu1 %v461_v20  ;;  %542 = vmatpush2.msra.mxu0 %v458_v21  ;;  %v370_v1 = vld [vmem:[#allocation2 + $0x400] sm:$0xff]  ;;  %v372_v2 = vld [vmem:[#allocation2 + $0x410] sm:$0xff]  ;;  %v367_v3 = vld [vmem:[#allocation2 + $0x3e8] sm:$0xff] }
  0x47   : > { %613 = vmatpush2.msra.mxu1 %v460_v22  ;;  %543 = vmatprep.subr.mxu0 %v451_v23  ;;  %v369_v4 = vld [vmem:[#allocation2 + $0x3f8] sm:$0xff]  ;;  %v213_v13 = vld [vmem:[%s207_s6] sm:$0x77]  ;;  %v368_v20 = vld [vmem:[#allocation2 + $0x3f0] sm:$0xff] }
  0x48   : > { %614 = vmatprep.subr.mxu1 %v453_v24  ;;  %544 = vmatpush2.msra.mxu0 %v450_v25  ;;  %v366_v19 = vld [vmem:[#allocation2 + $0x3e0] sm:$0xff]  ;;  %v359_v21 = vld [vmem:[#allocation2 + $0x3a8] sm:$0xff]  ;;  %v361_v22 = vld [vmem:[#allocation2 + $0x3b8] sm:$0xff] }
  0x49   : > { %615 = vmatpush2.msra.mxu1 %v452_v26  ;;  %545 = vmatprep.subr.mxu0 %v443_v27  ;;  %v358_v23 = vld [vmem:[#allocation2 + $0x3a0] sm:$0xff]  ;;  %v360_v24 = vld [vmem:[#allocation2 + $0x3b0] sm:$0xff]  ;;  %v351_v25 = vld [vmem:[#allocation2 + $0x368] sm:$0xff] }
  0x4a   : > { %616 = vmatprep.subr.mxu1 %v445_v28  ;;  %546 = vmatpush2.msra.mxu0 %v442_v29  ;;  %v353_v26 = vld [vmem:[#allocation2 + $0x378] sm:$0xff]  ;;  %v350_v27 = vld [vmem:[#allocation2 + $0x360] sm:$0xff]  ;;  %v352_v28 = vld [vmem:[#allocation2 + $0x370] sm:$0xff] }
  0x4b   : > { %617 = vmatpush2.msra.mxu1 %v444_v30  ;;  %547 = vmatprep.subr.mxu0 %v435_v31  ;;  %v343_v29 = vld [vmem:[#allocation2 + $0x328] sm:$0xff]  ;;  %v345_v30 = vld [vmem:[#allocation2 + $0x338] sm:$0xff]  ;;  %v342_v31 = vld [vmem:[#allocation2 + $0x320] sm:$0xff] }
  0x4c   : > { %618 = vmatprep.subr.mxu1 %v437_v32  ;;  %548 = vmatpush2.msra.mxu0 %v434_v33  ;;  %v344_v32 = vld [vmem:[#allocation2 + $0x330] sm:$0xff]  ;;  %v335_v33 = vld [vmem:[#allocation2 + $0x2e8] sm:$0xff]  ;;  %v265_v6 = vld [vmem:[#allocation2 + $0xb8] sm:$0xff] }
  0x4d   : > { %619 = vmatpush2.msra.mxu1 %v436_v34  ;;  %549 = vmatprep.subr.mxu0 %v427_v35  ;;  %v337_v34 = vld [vmem:[#allocation2 + $0x2f8] sm:$0xff]  ;;  %v334_v35 = vld [vmem:[#allocation2 + $0x2e0] sm:$0xff]  ;;  %v263_v5 = vld [vmem:[#allocation2 + $0xa8] sm:$0xff] }
  0x4e   : > { %620 = vmatprep.subr.mxu1 %v429_v36  ;;  %550 = vmatpush2.msra.mxu0 %v426_v37  ;;  %v336_v36 = vld [vmem:[#allocation2 + $0x2f0] sm:$0xff]  ;;  %v327_v37 = vld [vmem:[#allocation2 + $0x2a8] sm:$0xff]  ;;  %v262_v7 = vld [vmem:[#allocation2 + $0xa0] sm:$0xff] }
  0x4f   : > { %621 = vmatpush2.msra.mxu1 %v428_v38  ;;  %551 = vmatprep.subr.mxu0 %v419_v39  ;;  %v329_v38 = vld [vmem:[#allocation2 + $0x2b8] sm:$0xff]  ;;  %v326_v39 = vld [vmem:[#allocation2 + $0x2a0] sm:$0xff]  ;;  %v264_v8 = vld [vmem:[#allocation2 + $0xb0] sm:$0xff] }
  0x50   : > { %622 = vmatprep.subr.mxu1 %v421_v40  ;;  %552 = vmatpush2.msra.mxu0 %v418_v41  ;;  %v328_v40 = vld [vmem:[#allocation2 + $0x2b0] sm:$0xff]  ;;  %v319_v41 = vld [vmem:[#allocation2 + $0x268] sm:$0xff] }
  0x51   : > { %623 = vmatpush2.msra.mxu1 %v420_v42  ;;  %553 = vmatprep.subr.mxu0 %v411_v43  ;;  %v321_v42 = vld [vmem:[#allocation2 + $0x278] sm:$0xff]  ;;  %v318_v43 = vld [vmem:[#allocation2 + $0x260] sm:$0xff]  ;;  %v255_v9 = vld [vmem:[#allocation2 + $0x68] sm:$0xff] }
  0x52   : > { %624 = vmatprep.subr.mxu1 %v413_v44  ;;  %554 = vmatpush2.msra.mxu0 %v410_v45  ;;  %v320_v44 = vld [vmem:[#allocation2 + $0x270] sm:$0xff]  ;;  %v311_v45 = vld [vmem:[#allocation2 + $0x228] sm:$0xff] }
  0x53   : > { %625 = vmatpush2.msra.mxu1 %v412_v46  ;;  %555 = vmatprep.subr.mxu0 %v403_v47  ;;  %v313_v46 = vld [vmem:[#allocation2 + $0x238] sm:$0xff]  ;;  %v310_v47 = vld [vmem:[#allocation2 + $0x220] sm:$0xff] }
  0x54   : > { %626 = vmatprep.subr.mxu1 %v405_v48  ;;  %556 = vmatpush2.msra.mxu0 %v402_v49  ;;  %v312_v48 = vld [vmem:[#allocation2 + $0x230] sm:$0xff]  ;;  %v303_v49 = vld [vmem:[#allocation2 + $0x1e8] sm:$0xff] }
  0x55   : > { %627 = vmatpush2.msra.mxu1 %v404_v50  ;;  %557 = vmatprep.subr.mxu0 %v395_v51  ;;  %v305_v50 = vld [vmem:[#allocation2 + $0x1f8] sm:$0xff]  ;;  %v302_v51 = vld [vmem:[#allocation2 + $0x1e0] sm:$0xff] }
  0x56   : > { %628 = vmatprep.subr.mxu1 %v397_v52  ;;  %558 = vmatpush2.msra.mxu0 %v394_v53  ;;  %v304_v52 = vld [vmem:[#allocation2 + $0x1f0] sm:$0xff]  ;;  %v295_v53 = vld [vmem:[#allocation2 + $0x1a8] sm:$0xff] }
  0x57   : > { %629 = vmatpush2.msra.mxu1 %v396_v54  ;;  %559 = vmatprep.subr.mxu0 %v387_v55  ;;  %v297_v54 = vld [vmem:[#allocation2 + $0x1b8] sm:$0xff]  ;;  %v294_v55 = vld [vmem:[#allocation2 + $0x1a0] sm:$0xff] }
  0x58   : > { %630 = vmatprep.subr.mxu1 %v389_v56  ;;  %560 = vmatpush2.msra.mxu0 %v386_v57  ;;  %v296_v56 = vld [vmem:[#allocation2 + $0x1b0] sm:$0xff]  ;;  %v287_v57 = vld [vmem:[#allocation2 + $0x168] sm:$0xff] }
  0x59   : > { %631 = vmatpush2.msra.mxu1 %v388_v58  ;;  %561 = vmatprep.subr.mxu0 %v379_v59  ;;  %v289_v58 = vld [vmem:[#allocation2 + $0x178] sm:$0xff]  ;;  %v286_v59 = vld [vmem:[#allocation2 + $0x160] sm:$0xff] }
  0x5a   : > { %632 = vmatprep.subr.mxu1 %v381_v60  ;;  %562 = vmatpush2.msra.mxu0 %v378_v61  ;;  %v288_v60 = vld [vmem:[#allocation2 + $0x170] sm:$0xff]  ;;  %v279_v61 = vld [vmem:[#allocation2 + $0x128] sm:$0xff] }
  0x5b   : > { %633 = vmatpush2.msra.mxu1 %v380_v62  ;;  %563 = vmatprep.subr.mxu0 %v371_v63  ;;  %v281_v62 = vld [vmem:[#allocation2 + $0x138] sm:$0xff]  ;;  %v278_v63 = vld [vmem:[#allocation2 + $0x120] sm:$0xff] }
  0x5c   : > { %634 = vmatprep.subr.mxu1 %v373_v0  ;;  %564 = vmatpush2.msra.mxu0 %v370_v1  ;;  %v280_v0 = vld [vmem:[#allocation2 + $0x130] sm:$0xff]  ;;  %v271_v1 = vld [vmem:[#allocation2 + $0xe8] sm:$0xff] }
  0x5d   : > { %635 = vmatpush2.msra.mxu1 %v372_v2  ;;  %643 = vmatprep.subr.mxu0 %v367_v3  ;;  %v273_v2 = vld [vmem:[#allocation2 + $0xf8] sm:$0xff]  ;;  %v270_v3 = vld [vmem:[#allocation2 + $0xe0] sm:$0xff] }
  0x5e   : > { %714 = vmatprep.subr.mxu1 %v369_v4  ;;  %v272_v4 = vld [vmem:[#allocation2 + $0xf0] sm:$0xff] }
  0x98   : > { %v218_v11 = vpop.permute.xlu0 %217 }
  0x99   : > { %v225_v12 = vrot.slane %v218_v11, %v224_v10  ;;  %v254_v11 = vld [vmem:[#allocation2 + $0x60] sm:$0xff] }
  0x9b   : > { %v227_v15 = vsub.f32 %v213_v13, %v225_v12  ;;  %v256_v12 = vld [vmem:[#allocation2 + $0x70] sm:$0xff]  ;;  %v247_v13 = vld [vmem:[#allocation2 + $0x28] sm:$0xff] }
  0x9c   : > { %v232_v14 = vpop.permute.xlu0 %231 }
  0x9d   : > { %v239_v16 = vrot.slane %v232_v14, %v224_v10  ;;  %v257_v10 = vld [vmem:[#allocation2 + $0x78] sm:$0xff] }
  0x9e   : > { %v249_v14 = vld [vmem:[#allocation2 + $0x38] sm:$0xff] }
  0x9f   : > { %v1021_v17 = vmul.f32 %v239_v16, %v227_v15  ;;  %v246_v15 = vld [vmem:[#allocation2 + $0x20] sm:$0xff]  ;;  %v248_v16 = vld [vmem:[#allocation2 + $0x30] sm:$0xff] }
  0xa1   : > { %v499_v18 = vcombine.high %v1021_v17, %v1021_v17 }
  0xa3   : > { %565 = vmatprep.mubr.f32.mxu0 %v499_v18  ;;  %636 = vmatprep.mubr.f32.mxu1 %v499_v18 }
  0xa4   : > { %566 = vmatmul.mubr.f32.vlgmr.msra.gmra.mxu0 %v1021_v17  ;;  %637 = vmatmul.mubr.f32.vlgmr.msra.gmra.mxu1 %v1021_v17 }
  0xa5   : > { %644 = vmatpush1.msra.mxu0 %v366_v19  ;;  %715 = vmatpush1.msra.mxu1 %v368_v20  ;;  %v497_v19 = vld [vmem:[#allocation2 + $0x7f8] sm:$0xff]  ;;  %v494_v20 = vld [vmem:[#allocation2 + $0x7e0] sm:$0xff] }
  0xa6   : > { %645 = vmatprep.subr.mxu0 %v359_v21  ;;  %707 = vmatprep.mubr.f32.mxu0 %v499_v18  ;;  %v496_v21 = vld [vmem:[#allocation2 + $0x7f0] sm:$0xff] }
  0xa7   : > { %716 = vmatprep.subr.mxu1 %v361_v22  ;;  %778 = vmatprep.mubr.f32.mxu1 %v499_v18  ;;  %v495_v18 = vld [vmem:[#allocation2 + $0x7e8] sm:$0xff] }
  0xa8   : > { %646 = vmatpush1.msra.mxu0 %v358_v23  ;;  %717 = vmatpush1.msra.mxu1 %v360_v24  ;;  %v487_v22 = vld [vmem:[#allocation2 + $0x7a8] sm:$0xff]  ;;  %v489_v23 = vld [vmem:[#allocation2 + $0x7b8] sm:$0xff]  ;;  %v486_v24 = vld [vmem:[#allocation2 + $0x7a0] sm:$0xff] }
  0xa9   : > { %647 = vmatprep.subr.mxu0 %v351_v25  ;;  %718 = vmatprep.subr.mxu1 %v353_v26  ;;  %v488_v25 = vld [vmem:[#allocation2 + $0x7b0] sm:$0xff]  ;;  %v479_v26 = vld [vmem:[#allocation2 + $0x768] sm:$0xff] }
  0xaa   : > { %648 = vmatpush1.msra.mxu0 %v350_v27  ;;  %719 = vmatpush1.msra.mxu1 %v352_v28  ;;  %v481_v27 = vld [vmem:[#allocation2 + $0x778] sm:$0xff]  ;;  %v478_v28 = vld [vmem:[#allocation2 + $0x760] sm:$0xff] }
  0xab   : > { %649 = vmatprep.subr.mxu0 %v343_v29  ;;  %720 = vmatprep.subr.mxu1 %v345_v30  ;;  %v480_v29 = vld [vmem:[#allocation2 + $0x770] sm:$0xff]  ;;  %v471_v30 = vld [vmem:[#allocation2 + $0x728] sm:$0xff] }
  0xac   : > { %650 = vmatpush1.msra.mxu0 %v342_v31  ;;  %721 = vmatpush1.msra.mxu1 %v344_v32  ;;  %v473_v31 = vld [vmem:[#allocation2 + $0x738] sm:$0xff]  ;;  %v470_v32 = vld [vmem:[#allocation2 + $0x720] sm:$0xff] }
  0xad   : > { %651 = vmatprep.subr.mxu0 %v335_v33  ;;  %722 = vmatprep.subr.mxu1 %v337_v34  ;;  %v472_v33 = vld [vmem:[#allocation2 + $0x730] sm:$0xff]  ;;  %v463_v34 = vld [vmem:[#allocation2 + $0x6e8] sm:$0xff] }
  0xae   : > { %652 = vmatpush1.msra.mxu0 %v334_v35  ;;  %723 = vmatpush1.msra.mxu1 %v336_v36  ;;  %v465_v35 = vld [vmem:[#allocation2 + $0x6f8] sm:$0xff]  ;;  %v462_v36 = vld [vmem:[#allocation2 + $0x6e0] sm:$0xff] }
  0xaf   : > { %653 = vmatprep.subr.mxu0 %v327_v37  ;;  %724 = vmatprep.subr.mxu1 %v329_v38  ;;  %v464_v37 = vld [vmem:[#allocation2 + $0x6f0] sm:$0xff]  ;;  %v455_v38 = vld [vmem:[#allocation2 + $0x6a8] sm:$0xff] }
  0xb0   : > { %654 = vmatpush1.msra.mxu0 %v326_v39  ;;  %725 = vmatpush1.msra.mxu1 %v328_v40  ;;  %v457_v39 = vld [vmem:[#allocation2 + $0x6b8] sm:$0xff]  ;;  %v454_v40 = vld [vmem:[#allocation2 + $0x6a0] sm:$0xff] }
  0xb1   : > { %655 = vmatprep.subr.mxu0 %v319_v41  ;;  %726 = vmatprep.subr.mxu1 %v321_v42  ;;  %v456_v41 = vld [vmem:[#allocation2 + $0x6b0] sm:$0xff]  ;;  %v447_v42 = vld [vmem:[#allocation2 + $0x668] sm:$0xff] }
  0xb2   : > { %656 = vmatpush1.msra.mxu0 %v318_v43  ;;  %727 = vmatpush1.msra.mxu1 %v320_v44  ;;  %v449_v43 = vld [vmem:[#allocation2 + $0x678] sm:$0xff]  ;;  %v446_v44 = vld [vmem:[#allocation2 + $0x660] sm:$0xff] }
  0xb3   : > { %657 = vmatprep.subr.mxu0 %v311_v45  ;;  %728 = vmatprep.subr.mxu1 %v313_v46  ;;  %v448_v45 = vld [vmem:[#allocation2 + $0x670] sm:$0xff]  ;;  %v439_v46 = vld [vmem:[#allocation2 + $0x628] sm:$0xff] }
  0xb4   : > { %658 = vmatpush1.msra.mxu0 %v310_v47  ;;  %729 = vmatpush1.msra.mxu1 %v312_v48  ;;  %v441_v47 = vld [vmem:[#allocation2 + $0x638] sm:$0xff]  ;;  %v438_v48 = vld [vmem:[#allocation2 + $0x620] sm:$0xff] }
  0xb5   : > { %659 = vmatprep.subr.mxu0 %v303_v49  ;;  %730 = vmatprep.subr.mxu1 %v305_v50  ;;  %v440_v49 = vld [vmem:[#allocation2 + $0x630] sm:$0xff]  ;;  %v431_v50 = vld [vmem:[#allocation2 + $0x5e8] sm:$0xff] }
  0xb6   : > { %660 = vmatpush1.msra.mxu0 %v302_v51  ;;  %731 = vmatpush1.msra.mxu1 %v304_v52  ;;  %v433_v51 = vld [vmem:[#allocation2 + $0x5f8] sm:$0xff]  ;;  %v430_v52 = vld [vmem:[#allocation2 + $0x5e0] sm:$0xff] }
  0xb7   : > { %661 = vmatprep.subr.mxu0 %v295_v53  ;;  %732 = vmatprep.subr.mxu1 %v297_v54  ;;  %v432_v53 = vld [vmem:[#allocation2 + $0x5f0] sm:$0xff]  ;;  %v423_v54 = vld [vmem:[#allocation2 + $0x5a8] sm:$0xff] }
  0xb8   : > { %662 = vmatpush1.msra.mxu0 %v294_v55  ;;  %733 = vmatpush1.msra.mxu1 %v296_v56  ;;  %v425_v55 = vld [vmem:[#allocation2 + $0x5b8] sm:$0xff]  ;;  %v422_v56 = vld [vmem:[#allocation2 + $0x5a0] sm:$0xff] }
  0xb9   : > { %663 = vmatprep.subr.mxu0 %v287_v57  ;;  %734 = vmatprep.subr.mxu1 %v289_v58  ;;  %v424_v57 = vld [vmem:[#allocation2 + $0x5b0] sm:$0xff]  ;;  %v415_v58 = vld [vmem:[#allocation2 + $0x568] sm:$0xff] }
  0xba   : > { %664 = vmatpush1.msra.mxu0 %v286_v59  ;;  %735 = vmatpush1.msra.mxu1 %v288_v60  ;;  %v417_v59 = vld [vmem:[#allocation2 + $0x578] sm:$0xff]  ;;  %v414_v60 = vld [vmem:[#allocation2 + $0x560] sm:$0xff] }
  0xbb   : > { %665 = vmatprep.subr.mxu0 %v279_v61  ;;  %736 = vmatprep.subr.mxu1 %v281_v62  ;;  %v416_v61 = vld [vmem:[#allocation2 + $0x570] sm:$0xff]  ;;  %v407_v62 = vld [vmem:[#allocation2 + $0x528] sm:$0xff] }
  0xbc   : > { %666 = vmatpush1.msra.mxu0 %v278_v63  ;;  %737 = vmatpush1.msra.mxu1 %v280_v0  ;;  %v409_v63 = vld [vmem:[#allocation2 + $0x538] sm:$0xff]  ;;  %v406_v0 = vld [vmem:[#allocation2 + $0x520] sm:$0xff] }
  0xbd   : > { %667 = vmatprep.subr.mxu0 %v271_v1  ;;  %738 = vmatprep.subr.mxu1 %v273_v2  ;;  %v408_v1 = vld [vmem:[#allocation2 + $0x530] sm:$0xff]  ;;  %v399_v2 = vld [vmem:[#allocation2 + $0x4e8] sm:$0xff] }
  0xbe   : > { %668 = vmatpush1.msra.mxu0 %v270_v3  ;;  %739 = vmatpush1.msra.mxu1 %v272_v4  ;;  %v401_v3 = vld [vmem:[#allocation2 + $0x4f8] sm:$0xff]  ;;  %v398_v4 = vld [vmem:[#allocation2 + $0x4e0] sm:$0xff] }
  0xbf   : > { %669 = vmatprep.subr.mxu0 %v263_v5  ;;  %740 = vmatprep.subr.mxu1 %v265_v6  ;;  %v400_v5 = vld [vmem:[#allocation2 + $0x4f0] sm:$0xff]  ;;  %v391_v6 = vld [vmem:[#allocation2 + $0x4a8] sm:$0xff] }
  0xc0   : > { %670 = vmatpush1.msra.mxu0 %v262_v7  ;;  %741 = vmatpush1.msra.mxu1 %v264_v8  ;;  %v393_v7 = vld [vmem:[#allocation2 + $0x4b8] sm:$0xff]  ;;  %v390_v8 = vld [vmem:[#allocation2 + $0x4a0] sm:$0xff] }
  0xc1   : > { %671 = vmatprep.subr.mxu0 %v255_v9  ;;  %742 = vmatprep.subr.mxu1 %v257_v10  ;;  %v392_v9 = vld [vmem:[#allocation2 + $0x4b0] sm:$0xff]  ;;  %v383_v10 = vld [vmem:[#allocation2 + $0x468] sm:$0xff] }
  0xc2   : > { %672 = vmatpush1.msra.mxu0 %v254_v11  ;;  %743 = vmatpush1.msra.mxu1 %v256_v12  ;;  %v385_v11 = vld [vmem:[#allocation2 + $0x478] sm:$0xff]  ;;  %v382_v12 = vld [vmem:[#allocation2 + $0x460] sm:$0xff] }
  0xc3   : > { %673 = vmatprep.subr.mxu0 %v247_v13  ;;  %744 = vmatprep.subr.mxu1 %v249_v14  ;;  %v384_v13 = vld [vmem:[#allocation2 + $0x470] sm:$0xff]  ;;  %v375_v14 = vld [vmem:[#allocation2 + $0x428] sm:$0xff] }
  0xc4   : > { %674 = vmatpush1.msra.mxu0 %v246_v15  ;;  %745 = vmatpush1.msra.mxu1 %v248_v16  ;;  %v377_v15 = vld [vmem:[#allocation2 + $0x438] sm:$0xff]  ;;  %v374_v16 = vld [vmem:[#allocation2 + $0x420] sm:$0xff] }
  0xc5   : > { %675 = vmatprep.subr.mxu0 %v495_v18  ;;  %746 = vmatprep.subr.mxu1 %v497_v19  ;;  %v376_v18 = vld [vmem:[#allocation2 + $0x430] sm:$0xff] }
  0xc6   : > { %676 = vmatpush2.msra.mxu0 %v494_v20  ;;  %747 = vmatpush2.msra.mxu1 %v496_v21 }
  0xc7   : > { %677 = vmatprep.subr.mxu0 %v487_v22  ;;  %748 = vmatprep.subr.mxu1 %v489_v23 }
  0xc8   : > { %678 = vmatpush2.msra.mxu0 %v486_v24  ;;  %749 = vmatpush2.msra.mxu1 %v488_v25 }
  0xc9   : > { %679 = vmatprep.subr.mxu0 %v479_v26  ;;  %750 = vmatprep.subr.mxu1 %v481_v27 }
  0xca   : > { %680 = vmatpush2.msra.mxu0 %v478_v28  ;;  %751 = vmatpush2.msra.mxu1 %v480_v29 }
  0xcb   : > { %681 = vmatprep.subr.mxu0 %v471_v30  ;;  %752 = vmatprep.subr.mxu1 %v473_v31 }
  0xcc   : > { %682 = vmatpush2.msra.mxu0 %v470_v32  ;;  %753 = vmatpush2.msra.mxu1 %v472_v33 }
  0xcd   : > { %683 = vmatprep.subr.mxu0 %v463_v34  ;;  %754 = vmatprep.subr.mxu1 %v465_v35 }
  0xce   : > { %684 = vmatpush2.msra.mxu0 %v462_v36  ;;  %755 = vmatpush2.msra.mxu1 %v464_v37 }
  0xcf   : > { %685 = vmatprep.subr.mxu0 %v455_v38  ;;  %756 = vmatprep.subr.mxu1 %v457_v39 }
  0xd0   : > { %686 = vmatpush2.msra.mxu0 %v454_v40  ;;  %757 = vmatpush2.msra.mxu1 %v456_v41 }
  0xd1   : > { %687 = vmatprep.subr.mxu0 %v447_v42  ;;  %758 = vmatprep.subr.mxu1 %v449_v43 }
  0xd2   : > { %688 = vmatpush2.msra.mxu0 %v446_v44  ;;  %759 = vmatpush2.msra.mxu1 %v448_v45 }
  0xd3   : > { %689 = vmatprep.subr.mxu0 %v439_v46  ;;  %760 = vmatprep.subr.mxu1 %v441_v47 }
  0xd4   : > { %690 = vmatpush2.msra.mxu0 %v438_v48  ;;  %761 = vmatpush2.msra.mxu1 %v440_v49 }
  0xd5   : > { %691 = vmatprep.subr.mxu0 %v431_v50  ;;  %762 = vmatprep.subr.mxu1 %v433_v51 }
  0xd6   : > { %692 = vmatpush2.msra.mxu0 %v430_v52  ;;  %763 = vmatpush2.msra.mxu1 %v432_v53 }
  0xd7   : > { %693 = vmatprep.subr.mxu0 %v423_v54  ;;  %764 = vmatprep.subr.mxu1 %v425_v55 }
  0xd8   : > { %694 = vmatpush2.msra.mxu0 %v422_v56  ;;  %765 = vmatpush2.msra.mxu1 %v424_v57 }
  0xd9   : > { %695 = vmatprep.subr.mxu0 %v415_v58  ;;  %766 = vmatprep.subr.mxu1 %v417_v59 }
  0xda   : > { %696 = vmatpush2.msra.mxu0 %v414_v60  ;;  %767 = vmatpush2.msra.mxu1 %v416_v61 }
  0xdb   : > { %697 = vmatprep.subr.mxu0 %v407_v62  ;;  %768 = vmatprep.subr.mxu1 %v409_v63 }
  0xdc   : > { %698 = vmatpush2.msra.mxu0 %v406_v0  ;;  %769 = vmatpush2.msra.mxu1 %v408_v1 }
  0xdd   : > { %699 = vmatprep.subr.mxu0 %v399_v2  ;;  %770 = vmatprep.subr.mxu1 %v401_v3 }
  0xde   : > { %700 = vmatpush2.msra.mxu0 %v398_v4  ;;  %771 = vmatpush2.msra.mxu1 %v400_v5 }
  0xdf   : > { %701 = vmatprep.subr.mxu0 %v391_v6  ;;  %772 = vmatprep.subr.mxu1 %v393_v7 }
  0xe0   : > { %702 = vmatpush2.msra.mxu0 %v390_v8  ;;  %773 = vmatpush2.msra.mxu1 %v392_v9 }
  0xe1   : > { %703 = vmatprep.subr.mxu0 %v383_v10  ;;  %774 = vmatprep.subr.mxu1 %v385_v11 }
  0xe2   : > { %704 = vmatpush2.msra.mxu0 %v382_v12  ;;  %775 = vmatpush2.msra.mxu1 %v384_v13 }
  0xe3   : > { %705 = vmatprep.subr.mxu0 %v375_v14  ;;  %776 = vmatprep.subr.mxu1 %v377_v15 }
  0xe4   : > { %706 = vmatpush2.msra.mxu0 %v374_v16  ;;  %777 = vmatpush2.msra.mxu1 %v376_v18 }
  0xe5   : > { %708 = vmatmul.mubr.f32.vlgmr.msra.gmra.mxu0 %v1021_v17  ;;  %779 = vmatmul.mubr.f32.vlgmr.msra.gmra.mxu1 %v1021_v17 }
 0x164   : > { %v567_v19 = vpop.f32.mrf.mxu0  ;;  %v638_v20 = vpop.f32.mrf.mxu1 }
 0x166   : > { %v569_v21 = vpop.f32.mrf.mxu0  ;;  %v640_v22 = vpop.f32.mrf.mxu1 }
 0x167   : > { %v793_v23 = vcombine.low %v567_v19, %v569_v21  ;;  %v794_v24 = vcombine.low %v638_v20, %v640_v22 }
 0x169   : > { %801 = vst [vmem:[%s212_s10] sm:$0x77] %v793_v23  ;;  %802 = vst [vmem:[%s212_s10 + $0x8] sm:$0x77] %v794_v24 }
 0x1a5   : > { %v709_v25 = vpop.f32.mrf.mxu0  ;;  %v780_v26 = vpop.f32.mrf.mxu1 }
 0x1a7   : > { %v711_v27 = vpop.f32.mrf.mxu0  ;;  %v782_v28 = vpop.f32.mrf.mxu1 }
 0x1a8   : > { %v795_v29 = vcombine.low %v709_v25, %v711_v27  ;;  %v796_v30 = vcombine.low %v780_v26, %v782_v28 }
 0x1aa   : > { %803 = vst [vmem:[%s212_s10 + $0x10] sm:$0x77] %v795_v29  ;;  %804 = vst [vmem:[%s212_s10 + $0x18] sm:$0x77] %v796_v30 }
 0x1ab PF: > { %s15_s15 = sadd.s32 1, %s947_s15  }
 0x1ac   : > { %p12_p1 = scmp.ge.s32.totalorder %s15_s15, 4  }
 0x1ae   :  { %14 = sbr.rel (!%p12_p1) target bundleno = 1 (0x1), region = 71 }
 0x1b3   :  { %826 = vsyncpa [#allocation3], 1 }
 0x1b4   :  { %828 = vsyncpa [#allocation3 + $0x1], 1 }

</bundles_post_ra>
